<compile_context>
chip_gen: v7x
topology: tpu7x:2x2x1
jax: 0.10.0
libtpu: 0.0.40
codegen_flags: <defaults>
</compile_context>

<pallas_src>
import functools
import math

import jax
import jax.numpy as jnp
from jax.experimental import pallas as pl
from jax.experimental.pallas import tpu as pltpu

# Explicit scoped-VMEM budget: > default scoped limits (16 MiB v5e / 32 MiB v6e,v7x),
# < v7x's 64 MiB physical VMEM, and ample for the default tile sizes below.
_VMEM_LIMIT = 48 * 1024 * 1024


# --------------------------------------------------------------------------------------
# tiling plan
# --------------------------------------------------------------------------------------
def _lcm(a, b):
    return a * b // math.gcd(a, b)


def _round_up(a, b):
    return (a + b - 1) // b * b


def _plan(num_nodes, embed_dim, target_rows):
    """Rows-per-tile (multiple of 8 sublanes; tile*E multiple of 128 lanes) plus a 2-way
    split of the reduction axis so both v7x TensorCores stream HBM in the score pass."""
    q = _lcm(8, 128 // math.gcd(embed_dim, 128))
    tile = max(q, min(int(target_rows), _round_up(num_nodes, q)))
    tile = _round_up(tile, q)
    tiles = -(-num_nodes // tile)
    halves = 2 if tiles >= 2 else 1          # leading "parallel" grid axis (v7x megacore)
    tiles_per_half = -(-tiles // halves)
    n_pad = halves * tiles_per_half * tile
    return tile, halves, tiles_per_half, n_pad


def _pad_rows(x, n_pad):
    v, n, e = x.shape
    if n_pad == n:
        return x
    return jnp.pad(x, ((0, 0), (0, n_pad - n), (0, 0)))


# --------------------------------------------------------------------------------------
# kernels
# --------------------------------------------------------------------------------------
def _score_kernel(*refs, with_mv):
    # refs (with_mv=True):  x [V,TN,E], wq [E,H], wk [E,H], bqk [2,H], wmv [TN,E], acc [1,V,2]
    # refs (with_mv=False): x, wq, wk, bqk, acc
    # acc[:, :, 0] accumulates sum_n (xWq).(xWk) + (xWq).bk + bq.(xWk)   (N*bq.bk added in epilogue)
    # acc[:, :, 1] accumulates <flat(x_v), w_mv>   (padded rows of x and w_mv are zero -> no mask)
    if with_mv:
        x_ref, wq_ref, wk_ref, bqk_ref, wmv_ref, acc_ref = refs
    else:
        x_ref, wq_ref, wk_ref, bqk_ref, acc_ref = refs
        wmv_ref = None

    ti = pl.program_id(1)  # reduction axis is the last grid axis

    @pl.when(ti == 0)
    def _init():
        acc_ref[...] = jnp.zeros_like(acc_ref)

    v, tn, e = x_ref.shape
    x3 = x_ref[...]
    x2 = x3.reshape(v * tn, e)

    q = jnp.dot(x2, wq_ref[...], preferred_element_type=jnp.float32)   # no bias: zero-pad safe
    k = jnp.dot(x2, wk_ref[...], preferred_element_type=jnp.float32)
    bq = bqk_ref[0:1, :]
    bk = bqk_ref[1:2, :]
    prod = q * k + q * bk + bq * k                                      # [V*TN, H]
    prod3 = prod.reshape(v, tn, prod.shape[-1])
    score_p = jnp.sum(jnp.sum(prod3, axis=2), axis=1, keepdims=True)    # [V, 1]

    if with_mv:
        xw = x3 * wmv_ref[...][None, :, :]
        dot_p = jnp.sum(jnp.sum(xw, axis=2), axis=1, keepdims=True)     # [V, 1]
    else:
        dot_p = jnp.zeros_like(score_p)

    acc_ref[...] += jnp.concatenate([score_p, dot_p], axis=1)[None, :, :]


def _scale_views_kernel(s_ref, x_ref, o_ref):
    # s_ref: [V,1]; x_ref / o_ref: [V,C] lane-dense tiles of the flattened [V, N_pad*E] view.
    o_ref[...] = s_ref[...] * x_ref[...]


def _fused_apply_kernel(a_ref, c_ref, x_ref, res_ref, mv_ref, *, one_minus_beta):
    # a = beta*s_v, c = omega_v*s_v.  Single read of x produces both outputs.
    x = x_ref[...]
    mv = jnp.sum(c_ref[...] * x, axis=0, keepdims=True)       # [1, C]  (= mv_out tile)
    mv_ref[...] = mv
    res_ref[...] = a_ref[...] * x + one_minus_beta * mv


def _mv_dot_kernel(x_ref, w_ref, acc_ref):
    # Standalone mv_attn score: acc[v] += <x_v tile, w tile>.  Output block is the accumulator.
    ti = pl.program_id(0)

    @pl.when(ti == 0)
    def _init():
        acc_ref[...] = jnp.zeros_like(acc_ref)

    acc_ref[...] += jnp.sum(x_ref[...] * w_ref[...], axis=1, keepdims=True)


def _mv_apply_kernel(w_ref, x_ref, o_ref):
    o_ref[...] = jnp.sum(w_ref[...] * x_ref[...], axis=0, keepdims=True)


# --------------------------------------------------------------------------------------
# pass wrappers
# --------------------------------------------------------------------------------------
def _score_pass(x_pad, wq, wk, bq, bk, w_mv, *, num_nodes, tile, halves, tiles_per_half):
    """Single streaming read of x; returns the raw [V, 2] reduction (bias term NOT added)."""
    v, n_pad, e = x_pad.shape
    h = wq.shape[-1]
    with_mv = w_mv is not None

    bqk = jnp.concatenate([jnp.asarray(bq, jnp.float32).reshape(1, h),
                           jnp.asarray(bk, jnp.float32).reshape(1, h)], axis=0)      # [2, H]

    ops = [x_pad, jnp.asarray(wq, jnp.float32), jnp.asarray(wk, jnp.float32), bqk]
    in_specs = [
        pl.BlockSpec((v, tile, e), lambda pi, ti: (0, pi * tiles_per_half + ti, 0)),
        pl.BlockSpec((e, h), lambda pi, ti: (0, 0)),
        pl.BlockSpec((e, h), lambda pi, ti: (0, 0)),
        pl.BlockSpec((2, h), lambda pi, ti: (0, 0)),
    ]
    if with_mv:
        wmv2 = jnp.asarray(w_mv, jnp.float32).reshape(num_nodes, e)
        if n_pad != num_nodes:
            wmv2 = jnp.pad(wmv2, ((0, n_pad - num_nodes), (0, 0)))
        ops.append(wmv2)
        in_specs.append(pl.BlockSpec((tile, e), lambda pi, ti: (pi * tiles_per_half + ti, 0)))

    kernel = functools.partial(_score_kernel, with_mv=with_mv)
    cost = pl.CostEstimate(
        flops=4 * v * n_pad * e * h + 6 * v * n_pad * h + (2 * v * n_pad * e if with_mv else 0),
        transcendentals=0,
        bytes_accessed=4 * (v * n_pad * e + 2 * e * h + 2 * h
                            + (n_pad * e if with_mv else 0) + halves * v * 2),
    )
    acc = pl.pallas_call(
        kernel,
        out_shape=jax.ShapeDtypeStruct((halves, v, 2), jnp.float32),
        grid=(halves, tiles_per_half),
        in_specs=in_specs,
        out_specs=pl.BlockSpec((1, v, 2), lambda pi, ti: (pi, 0, 0)),
        compiler_params=pltpu.CompilerParams(
            dimension_semantics=("parallel", "arbitrary"),
            vmem_limit_bytes=_VMEM_LIMIT),
        cost_estimate=cost,
    )(*ops)
    return jnp.sum(acc, axis=0)   # tiny [V, 2] epilogue combine of the two halves


def _scale_views(scale, x_flat, *, tile_cols):
    v, lanes = x_flat.shape
    cost = pl.CostEstimate(flops=v * lanes, transcendentals=0,
                           bytes_accessed=4 * (2 * v * lanes + v))
    return pl.pallas_call(
        _scale_views_kernel,
        out_shape=jax.ShapeDtypeStruct((v, lanes), jnp.float32),
        grid=(lanes // tile_cols,),
        in_specs=[pl.BlockSpec((v, 1), lambda ti: (0, 0)),
                  pl.BlockSpec((v, tile_cols), lambda ti: (0, ti))],
        out_specs=pl.BlockSpec((v, tile_cols), lambda ti: (0, ti)),
        compiler_params=pltpu.CompilerParams(
            dimension_semantics=("parallel",), vmem_limit_bytes=_VMEM_LIMIT),
        cost_estimate=cost,
    )(scale, x_flat)


def _fused_apply(a, c, x_flat, *, tile_cols, one_minus_beta):
    v, lanes = x_flat.shape
    kernel = functools.partial(_fused_apply_kernel, one_minus_beta=one_minus_beta)
    cost = pl.CostEstimate(flops=5 * v * lanes, transcendentals=0,
                           bytes_accessed=4 * (2 * v * lanes + lanes + 2 * v))
    return pl.pallas_call(
        kernel,
        out_shape=(jax.ShapeDtypeStruct((v, lanes), jnp.float32),
                   jax.ShapeDtypeStruct((1, lanes), jnp.float32)),
        grid=(lanes // tile_cols,),
        in_specs=[pl.BlockSpec((v, 1), lambda ti: (0, 0)),
                  pl.BlockSpec((v, 1), lambda ti: (0, 0)),
                  pl.BlockSpec((v, tile_cols), lambda ti: (0, ti))],
        out_specs=(pl.BlockSpec((v, tile_cols), lambda ti: (0, ti)),
                   pl.BlockSpec((1, tile_cols), lambda ti: (0, ti))),
        compiler_params=pltpu.CompilerParams(
            dimension_semantics=("parallel",), vmem_limit_bytes=_VMEM_LIMIT),
        cost_estimate=cost,
    )(a, c, x_flat)


# --------------------------------------------------------------------------------------
# public forwards (module semantics)
# --------------------------------------------------------------------------------------
def self_attn_forward(x, wq, bq, wk, bk, *, tile_rows=1024):
    """Pallas port of MVURE `self_attn.forward`.  x: [V, N, E]; wq/wk: [E, H]; bq/bk: [1, H]."""
    x = jnp.asarray(x, jnp.float32)
    v, n, e = x.shape
    h = wq.shape[-1]
    tile, halves, tph, n_pad = _plan(n, e, tile_rows)
    x_pad = _pad_rows(x, n_pad)
    x_flat = x_pad.reshape(v, n_pad * e)                       # metadata-only reshape

    acc = _score_pass(x_pad, wq, wk, bq, bk, None,
                      num_nodes=n, tile=tile, halves=halves, tiles_per_half=tph)
    bq_f = jnp.asarray(bq, jnp.float32).reshape(-1)
    bk_f = jnp.asarray(bk, jnp.float32).reshape(-1)
    score = (acc[:, 0] + n * jnp.sum(bq_f * bk_f)) / math.sqrt(h * n)
    attn = jax.nn.softmax(score, axis=0)[:, None]              # [V, 1]

    out_flat = _scale_views(attn, x_flat, tile_cols=tile * e)
    return out_flat[:, : n * e].reshape(v, n, e)


def mv_attn_forward(x, w, b, *, tile_rows=1024):
    """Pallas port of MVURE `mv_attn.forward`.  x: [V, N, E]; w: [N*E]; b: scalar."""
    x = jnp.asarray(x, jnp.float32)
    v, n, e = x.shape
    tile, _, _, n_pad = _plan(n, e, tile_rows)
    lanes = n_pad * e
    c = tile * e
    x_flat = _pad_rows(x, n_pad).reshape(v, lanes)
    w_flat = jnp.asarray(w, jnp.float32).reshape(1, n * e)
    if lanes != n * e:
        w_flat = jnp.pad(w_flat, ((0, 0), (0, lanes - n * e)))   # zero pad -> no in-kernel mask

    cost = pl.CostEstimate(flops=2 * v * lanes, transcendentals=0,
                           bytes_accessed=4 * (v * lanes + lanes + v))
    dot = pl.pallas_call(
        _mv_dot_kernel,
        out_shape=jax.ShapeDtypeStruct((v, 1), jnp.float32),
        grid=(lanes // c,),
        in_specs=[pl.BlockSpec((v, c), lambda ti: (0, ti)),
                  pl.BlockSpec((1, c), lambda ti: (0, ti))],
        out_specs=pl.BlockSpec((v, 1), lambda ti: (0, 0)),
        compiler_params=pltpu.CompilerParams(
            dimension_semantics=("arbitrary",), vmem_limit_bytes=_VMEM_LIMIT),
        cost_estimate=cost,
    )(x_flat, w_flat)
    omega = jax.nn.sigmoid(dot + jnp.asarray(b, jnp.float32).reshape(1, 1))   # [V, 1]

    cost = pl.CostEstimate(flops=2 * v * lanes, transcendentals=0,
                           bytes_accessed=4 * (v * lanes + lanes + v))
    out = pl.pallas_call(
        _mv_apply_kernel,
        out_shape=jax.ShapeDtypeStruct((1, lanes), jnp.float32),
        grid=(lanes // c,),
        in_specs=[pl.BlockSpec((v, 1), lambda ti: (0, 0)),
                  pl.BlockSpec((v, c), lambda ti: (0, ti))],
        out_specs=pl.BlockSpec((1, c), lambda ti: (0, ti)),
        compiler_params=pltpu.CompilerParams(
            dimension_semantics=("parallel",), vmem_limit_bytes=_VMEM_LIMIT),
        cost_estimate=cost,
    )(omega, x_flat)
    return out[0, : n * e].reshape(n, e)


def mvure_fuse_forward(x, wq, bq, wk, bk, w_mv, b_mv, *, alpha=0.8, beta=0.5, tile_rows=1024):
    """Post-GAT part of MVURE_Layer.forward on the stacked view embeddings x=[V,N,E].

    Fully fused: one score pass over x (both reductions), tiny XLA epilogue, one apply pass
    that emits both `mv_out` [N,E] and `result` [V,N,E] — exactly like the torch module.
    """
    # TODO(synk): the three GATConv branches (DGL graph message passing) have no clean Pallas
    # equivalent here; this wrapper takes their stacked outputs `x` as its input.
    x = jnp.asarray(x, jnp.float32)
    v, n, e = x.shape
    h = wq.shape[-1]
    tile, halves, tph, n_pad = _plan(n, e, tile_rows)
    x_pad = _pad_rows(x, n_pad)
    x_flat = x_pad.reshape(v, n_pad * e)                          # metadata-only reshape

    acc = _score_pass(x_pad, wq, wk, bq, bk, w_mv,
                      num_nodes=n, tile=tile, halves=halves, tiles_per_half=tph)  # [V, 2]

    # tiny epilogue on [V]-sized arrays (softmax / sigmoid / per-view scales)
    bq_f = jnp.asarray(bq, jnp.float32).reshape(-1)
    bk_f = jnp.asarray(bk, jnp.float32).reshape(-1)
    score = (acc[:, 0] + n * jnp.sum(bq_f * bk_f)) / math.sqrt(h * n)
    attn = jax.nn.softmax(score, axis=0)                          # [V]
    s = alpha * attn + (1.0 - alpha)                              # x2_v = s_v * x_v (never built)
    omega = jax.nn.sigmoid(s * acc[:, 1] + jnp.asarray(b_mv, jnp.float32).reshape(()))
    a = (beta * s)[:, None]                                       # [V, 1]
    c = (omega * s)[:, None]                                      # [V, 1]

    res_flat, mv_flat = _fused_apply(a, c, x_flat, tile_cols=tile * e,
                                     one_minus_beta=1.0 - beta)
    result = res_flat[:, : n * e].reshape(v, n, e)
    mv_out = mv_flat[0, : n * e].reshape(n, e)
    return mv_out, result


# --------------------------------------------------------------------------------------
# pure-JAX references + demo
# --------------------------------------------------------------------------------------
def _ref_self_attn(x, wq, bq, wk, bk):
    v, n, e = x.shape
    h = wq.shape[-1]
    q = x.reshape(v * n, e) @ wq + bq.reshape(1, h)
    k = x.reshape(v * n, e) @ wk + bk.reshape(1, h)
    s = jnp.sum((q * k).reshape(v, -1), axis=-1) / math.sqrt(h * n)
    attn = jax.nn.softmax(s, axis=0)
    return attn[:, None, None] * x


def _ref_mv_attn(x, w, b):
    v, n, e = x.shape
    omega = jax.nn.sigmoid(x.reshape(v, -1) @ w + b)
    return jnp.sum(omega[:, None, None] * x, axis=0)


if __name__ == "__main__":
    V, N, E, H = 3, 64, 32, 4            # 3 views (s / t / poi); H = E // num_heads like the module
    ALPHA, BETA = 0.8, 0.5

    key = jax.random.PRNGKey(0)
    kx, kx2, kwq, kbq, kwk, kbk, kwm, kbm = jax.random.split(key, 8)

    x = jax.random.normal(kx, (V, N, E), dtype=jnp.float32)

    bound = 1.0 / math.sqrt(E)
    wq = jax.random.uniform(kwq, (E, H), jnp.float32, -bound, bound)
    bq = jax.random.uniform(kbq, (1, H), jnp.float32, -bound, bound)
    wk = jax.random.uniform(kwk, (E, H), jnp.float32, -bound, bound)
    bk = jax.random.uniform(kbk, (1, H), jnp.float32, -bound, bound)

    bound_mv = 1.0 / math.sqrt(N * E)
    w_mv = jax.random.uniform(kwm, (N * E,), jnp.float32, -bound_mv, bound_mv)
    b_mv = jax.random.uniform(kbm, (), jnp.float32, -bound_mv, bound_mv)

    tol = dict(atol=1e-4, rtol=1e-4)

    # 1) self_attn with a multi-tile grid (tile=16 -> 2 parallel halves x 2 reduction steps).
    fn = jax.jit(functools.partial(self_attn_forward, tile_rows=16))
    out = jax.block_until_ready(fn(x, wq, bq, wk, bk))
    assert out.shape == (V, N, E) and out.dtype == jnp.float32
    assert jnp.allclose(out, _ref_self_attn(x, wq, bq, wk, bk), **tol), "self_attn mismatch"

    # 2) self_attn with a node count that does not divide the tile (zero-padded last tile).
    N2 = 52
    x_odd = jax.random.normal(kx2, (V, N2, E), dtype=jnp.float32)
    out2 = jax.block_until_ready(fn(x_odd, wq, bq, wk, bk))
    assert jnp.allclose(out2, _ref_self_attn(x_odd, wq, bq, wk, bk), **tol), \
        "self_attn (padded N) mismatch"

    # 3) mv_attn.
    fn_mv = jax.jit(functools.partial(mv_attn_forward, tile_rows=16))
    mv = jax.block_until_ready(fn_mv(x, w_mv, b_mv))
    assert jnp.allclose(mv, _ref_mv_attn(x, w_mv, b_mv), **tol), "mv_attn mismatch"

    # fused-path reference
    fused_ref = _ref_self_attn(x, wq, bq, wk, bk)
    x2_ref = ALPHA * fused_ref + (1.0 - ALPHA) * x
    mv_ref = _ref_mv_attn(x2_ref, w_mv, b_mv)
    result_ref = BETA * x2_ref + (1.0 - BETA) * mv_ref[None]

    # 4) fully fused post-GAT MVURE_Layer forward: multi-tile grid ...
    fn_fuse_small = jax.jit(functools.partial(mvure_fuse_forward, alpha=ALPHA, beta=BETA,
                                              tile_rows=16))
    mv_out, result = jax.block_until_ready(fn_fuse_small(x, wq, bq, wk, bk, w_mv, b_mv))
    assert jnp.allclose(mv_out, mv_ref, **tol), "fused mv_out mismatch (small tiles)"
    assert jnp.allclose(result, result_ref, **tol), "fused result mismatch (small tiles)"

    # ... and default tiling (single-tile grid path).
    fn_fuse = jax.jit(functools.partial(mvure_fuse_forward, alpha=ALPHA, beta=BETA))
    mv_out, result = jax.block_until_ready(fn_fuse(x, wq, bq, wk, bk, w_mv, b_mv))
    assert jnp.allclose(mv_out, mv_ref, **tol), "fused mv_out mismatch"
    assert jnp.allclose(result, result_ref, **tol), "fused result mismatch"

    print("KERNEL_OK")
</pallas_src>

<mosaic_0001>
module attributes {stable_mosaic.version = 11 : i64} {
  func.func @_score_kernel(%arg0: i32, %arg1: i32, %arg2: memref<3x16x32xf32, #tpu.memory_space<vmem>>, %arg3: memref<32x4xf32, #tpu.memory_space<vmem>>, %arg4: memref<32x4xf32, #tpu.memory_space<vmem>>, %arg5: memref<2x4xf32, #tpu.memory_space<vmem>>, %arg6: memref<1x3x2xf32, #tpu.memory_space<vmem>>) attributes {dimension_semantics = [#tpu.dimension_semantics<parallel>, #tpu.dimension_semantics<arbitrary>], iteration_bounds = array<i64: 2, 2>, scalar_prefetch = 0 : i64, scratch_operands = 0 : i64, tpu.core_type = #tpu.core_type<tc>, window_params = [{transform_indices = @transform_0, window_bounds = array<i64: 3, 16, 32>}, {pipeline_mode = #tpu.pipeline_mode<synchronous>, transform_indices = @transform_1, window_bounds = array<i64: 32, 4>}, {pipeline_mode = #tpu.pipeline_mode<synchronous>, transform_indices = @transform_2, window_bounds = array<i64: 32, 4>}, {pipeline_mode = #tpu.pipeline_mode<synchronous>, transform_indices = @transform_3, window_bounds = array<i64: 2, 4>}, {transform_indices = @transform_4, window_bounds = array<i64: 1, 3, 2>}]} {
    %c0_i32 = arith.constant 0 : i32
    %0 = arith.cmpi eq, %arg1, %c0_i32 : i32
    %1 = arith.extui %0 : i1 to i32
    %c0_i32_0 = arith.constant 0 : i32
    %2 = arith.cmpi ne, %1, %c0_i32_0 : i32
    scf.if %2 {
      %cst_20 = arith.constant 0.000000e+00 : f32
      %28 = vector.broadcast %cst_20 : f32 to vector<1x3x2xf32>
      %c0_21 = arith.constant 0 : index
      %c0_22 = arith.constant 0 : index
      %c0_23 = arith.constant 0 : index
      %29 = vector.load %arg6[%c0_21, %c0_22, %c0_23] : memref<1x3x2xf32, #tpu.memory_space<vmem>>, vector<1x3x2xf32>
      tpu.vector_store %arg6[%c0_21, %c0_22, %c0_23], %28 {strides = array<i32>} : memref<1x3x2xf32, #tpu.memory_space<vmem>>, vector<1x3x2xf32>,
    } else {
    }
    %c0 = arith.constant 0 : index
    %c0_1 = arith.constant 0 : index
    %c0_2 = arith.constant 0 : index
    %3 = vector.load %arg2[%c0, %c0_1, %c0_2] : memref<3x16x32xf32, #tpu.memory_space<vmem>>, vector<3x16x32xf32>
    %4 = vector.shape_cast %3 : vector<3x16x32xf32> to vector<48x32xf32>
    %c0_3 = arith.constant 0 : index
    %c0_4 = arith.constant 0 : index
    %5 = vector.load %arg3[%c0_3, %c0_4] : memref<32x4xf32, #tpu.memory_space<vmem>>, vector<32x4xf32>
    %cst = arith.constant dense<0.000000e+00> : vector<48x4xf32>
    %6 = tpu.matmul %4, %5, %cst {dimension_numbers = #tpu.dot_dimension_numbers<[1], [0], [0], [1], [0, 0, 1, 1], [], []>} : vector<48x32xf32>, vector<32x4xf32>, vector<48x4xf32> -> vector<48x4xf32>
    %c0_5 = arith.constant 0 : index
    %c0_6 = arith.constant 0 : index
    %7 = vector.load %arg4[%c0_5, %c0_6] : memref<32x4xf32, #tpu.memory_space<vmem>>, vector<32x4xf32>
    %cst_7 = arith.constant dense<0.000000e+00> : vector<48x4xf32>
    %8 = tpu.matmul %4, %7, %cst_7 {dimension_numbers = #tpu.dot_dimension_numbers<[1], [0], [0], [1], [0, 0, 1, 1], [], []>} : vector<48x32xf32>, vector<32x4xf32>, vector<48x4xf32> -> vector<48x4xf32>
    %c0_8 = arith.constant 0 : index
    %c0_9 = arith.constant 0 : index
    %9 = vector.load %arg5[%c0_8, %c0_9] : memref<2x4xf32, #tpu.memory_space<vmem>>, vector<1x4xf32>
    %c1 = arith.constant 1 : index
    %c0_10 = arith.constant 0 : index
    %10 = vector.load %arg5[%c1, %c0_10] : memref<2x4xf32, #tpu.memory_space<vmem>>, vector<1x4xf32>
    %11 = arith.mulf %6, %8 : vector<48x4xf32>
    %12 = vector.broadcast %10 : vector<1x4xf32> to vector<48x4xf32>
    %13 = arith.mulf %6, %12 : vector<48x4xf32>
    %14 = arith.addf %11, %13 : vector<48x4xf32>
    %15 = vector.broadcast %9 : vector<1x4xf32> to vector<48x4xf32>
    %16 = arith.mulf %15, %8 : vector<48x4xf32>
    %17 = arith.addf %14, %16 : vector<48x4xf32>
    %18 = vector.shape_cast %17 : vector<48x4xf32> to vector<3x16x4xf32>
    %cst_11 = arith.constant dense<0.000000e+00> : vector<3x16xf32>
    %19 = vector.multi_reduction <add>, %18, %cst_11 [2] : vector<3x16x4xf32> to vector<3x16xf32>
    %cst_12 = arith.constant dense<0.000000e+00> : vector<3xf32>
    %20 = vector.multi_reduction <add>, %19, %cst_12 [1] : vector<3x16xf32> to vector<3xf32>
    %21 = vector.shape_cast %20 : vector<3xf32> to vector<3x1xf32>
    %cst_13 = arith.constant 0.000000e+00 : f32
    %22 = vector.broadcast %cst_13 : f32 to vector<3x1xf32>
    %c0_14 = arith.constant 0 : index
    %c0_15 = arith.constant 0 : index
    %c0_16 = arith.constant 0 : index
    %23 = vector.load %arg6[%c0_14, %c0_15, %c0_16] : memref<1x3x2xf32, #tpu.memory_space<vmem>>, vector<1x3x2xf32>
    %24 = tpu.concatenate %21, %22 in 1 : vector<3x1xf32>, vector<3x1xf32> -> vector<3x2xf32>
    %25 = vector.shape_cast %24 : vector<3x2xf32> to vector<1x3x2xf32>
    %26 = arith.addf %23, %25 : vector<1x3x2xf32>
    %c0_17 = arith.constant 0 : index
    %c0_18 = arith.constant 0 : index
    %c0_19 = arith.constant 0 : index
    %27 = vector.load %arg6[%c0_17, %c0_18, %c0_19] : memref<1x3x2xf32, #tpu.memory_space<vmem>>, vector<1x3x2xf32>
    tpu.vector_store %arg6[%c0_17, %c0_18, %c0_19], %26 {strides = array<i32>} : memref<1x3x2xf32, #tpu.memory_space<vmem>>, vector<1x3x2xf32>,
    return
  }
  func.func @transform_0(%arg0: i32, %arg1: i32) -> (i32, i32, i32) {
    %c2_i32 = arith.constant 2 : i32
    %0 = arith.muli %arg0, %c2_i32 : i32
    %1 = arith.addi %0, %arg1 : i32
    %c0_i32 = arith.constant 0 : i32
    %c0_i32_0 = arith.constant 0 : i32
    %c0_i32_1 = arith.constant 0 : i32
    return %c0_i32, %1, %c0_i32_0 : i32, i32, i32
  }
  func.func @transform_1(%arg0: i32, %arg1: i32) -> (i32, i32) {
    %c0_i32 = arith.constant 0 : i32
    %c0_i32_0 = arith.constant 0 : i32
    %c0_i32_1 = arith.constant 0 : i32
    return %c0_i32, %c0_i32_0 : i32, i32
  }
  func.func @transform_2(%arg0: i32, %arg1: i32) -> (i32, i32) {
    %c0_i32 = arith.constant 0 : i32
    %c0_i32_0 = arith.constant 0 : i32
    %c0_i32_1 = arith.constant 0 : i32
    return %c0_i32, %c0_i32_0 : i32, i32
  }
  func.func @transform_3(%arg0: i32, %arg1: i32) -> (i32, i32) {
    %c0_i32 = arith.constant 0 : i32
    %c0_i32_0 = arith.constant 0 : i32
    %c0_i32_1 = arith.constant 0 : i32
    return %c0_i32, %c0_i32_0 : i32, i32
  }
  func.func @transform_4(%arg0: i32, %arg1: i32) -> (i32, i32, i32) {
    %c0_i32 = arith.constant 0 : i32
    %c0_i32_0 = arith.constant 0 : i32
    %c0_i32_1 = arith.constant 0 : i32
    return %arg0, %c0_i32, %c0_i32_0 : i32, i32, i32
  }
}

module attributes {stable_mosaic.version = 11 : i64} {
  func.func @_scale_views_kernel(%arg0: i32, %arg1: memref<3x1xf32, #tpu.memory_space<vmem>>, %arg2: memref<3x512xf32, #tpu.memory_space<vmem>>, %arg3: memref<3x512xf32, #tpu.memory_space<vmem>>) attributes {dimension_semantics = [#tpu.dimension_semantics<parallel>], iteration_bounds = array<i64: 4>, scalar_prefetch = 0 : i64, scratch_operands = 0 : i64, tpu.core_type = #tpu.core_type<tc>, window_params = [{pipeline_mode = #tpu.pipeline_mode<synchronous>, transform_indices = @transform_0, window_bounds = array<i64: 3, 1>}, {transform_indices = @transform_1, window_bounds = array<i64: 3, 512>}, {transform_indices = @transform_2, window_bounds = array<i64: 3, 512>}]} {
    %c0 = arith.constant 0 : index
    %c0_0 = arith.constant 0 : index
    %0 = vector.load %arg1[%c0, %c0_0] : memref<3x1xf32, #tpu.memory_space<vmem>>, vector<3x1xf32>
    %c0_1 = arith.constant 0 : index
    %c0_2 = arith.constant 0 : index
    %1 = vector.load %arg2[%c0_1, %c0_2] : memref<3x512xf32, #tpu.memory_space<vmem>>, vector<3x512xf32>
    %2 = vector.broadcast %0 : vector<3x1xf32> to vector<3x512xf32>
    %3 = arith.mulf %2, %1 : vector<3x512xf32>
    %c0_3 = arith.constant 0 : index
    %c0_4 = arith.constant 0 : index
    %4 = vector.load %arg3[%c0_3, %c0_4] : memref<3x512xf32, #tpu.memory_space<vmem>>, vector<3x512xf32>
    tpu.vector_store %arg3[%c0_3, %c0_4], %3 {strides = array<i32>} : memref<3x512xf32, #tpu.memory_space<vmem>>, vector<3x512xf32>,
    return
  }
  func.func @transform_0(%arg0: i32) -> (i32, i32) {
    %c0_i32 = arith.constant 0 : i32
    %c0_i32_0 = arith.constant 0 : i32
    %c0_i32_1 = arith.constant 0 : i32
    return %c0_i32, %c0_i32_0 : i32, i32
  }
  func.func @transform_1(%arg0: i32) -> (i32, i32) {
    %c0_i32 = arith.constant 0 : i32
    %c0_i32_0 = arith.constant 0 : i32
    return %c0_i32, %arg0 : i32, i32
  }
  func.func @transform_2(%arg0: i32) -> (i32, i32) {
    %c0_i32 = arith.constant 0 : i32
    %c0_i32_0 = arith.constant 0 : i32
    return %c0_i32, %arg0 : i32, i32
  }
}

</mosaic_0001>

<bundles_post_ra>
// kernel: self_attn_forward.3
= control target key start
LH: loop header
LB: loop body
LE: loop exit
PB: predicated region body
PF: predicated region fallthrough
CT: control target
= control target key end

     0   :  { %s278_s9 = smov 0   ;;  %s298_s0 = inlined_call_operand.vmem [shape: f32[3,1], index: 0, kind: input, shape index: {}]   ;;  %s299_s1 = inlined_call_operand.vmem [shape: f32[3,2048], index: 1, kind: input, shape index: {}]   ;;  %s300_s2 = inlined_call_operand.vmem [shape: f32[3,2048], index: 2, kind: output, shape index: {}]  }
   0x1 LB: > { %s231_s10 = sadd.s32 4294967295, %s260_s9   ;;  %p235_p0 = scmp.ge.s32.totalorder %s260_s9, 1  ;;  %s260_s9 = sphi %s278_s9, %s12_s9  }
   0x2   : > { %p113_p1 = scmp.lt.s32.totalorder %s260_s9, 5 }
   0x4   : > { %p114_p2 = pnand %p235_p0, %p113_p1 }
   0x5   : > { %v147_v0 = vld [vmem:[%s298_s0] sm:$0x7] (!%p114_p2)  ;;  %v262_v1 = vmov (!%p114_p2), 0   ;;  %s236_s13 = sshll.u32 (!%p114_p2), %s231_s10, 2 }
   0x6   : > { %117 = sbr.rel (%p114_p2) target bundleno = 140 (0x8c), region = 28  ;;  %251 = vset.pattern.permute.xlu0 (!%p114_p2), %v262_v1  ;;  %p136_p3 = scmp.lt.s32.totalorder (!%p114_p2), %s236_s13, 15 }
   0x7   : > { %152 = vperm.xlu0 (!%p114_p2), %251, %v147_v0  }
   0xd   : > { %s302_s13 = smov (!%p136_p3, %s236_s13), 15 }
   0xe   : > { %s237_s14 = sshll.u32 %s302_s13, 2 }
   0xf   : > { %s139_s17 = scalar_lea.vmem %s299_s1, %s237_s14  ;;  %s145_s20 = scalar_lea.vmem %s300_s2, %s237_s14 }
  0x10   : > { %v148_v2 = vld [vmem:[%s139_s17] sm:$0x77]  ;;  %v149_v3 = vld [vmem:[%s139_s17 + $0x8] sm:$0x77] }
  0x11   : > { %v157_v4 = vcombine.high %v148_v2, %v148_v2  ;;  %v158_v5 = vcombine.high %v149_v3, %v149_v3 }
  0x86   : > { %v153_v6 = vpop.permute.xlu0 %152 }
  0x87   : > { %v161_v7 = vmul.f32 %v153_v6, %v148_v2  ;;  %v162_v8 = vmul.f32 %v157_v4, %v153_v6  ;;  %v163_v9 = vmul.f32 %v153_v6, %v149_v3  ;;  %v164_v10 = vmul.f32 %v158_v5, %v153_v6 }
  0x89   : > { %v169_v11 = vcombine.low %v161_v7, %v162_v8  ;;  %v170_v12 = vcombine.low %v163_v9, %v164_v10 }
  0x8b   : > { %173 = vst [vmem:[%s145_s20] sm:$0x77] %v169_v11  ;;  %174 = vst [vmem:[%s145_s20 + $0x8] sm:$0x77] %v170_v12 }
  0x8c PF: > { %s12_s9 = sadd.s32 1, %s260_s9  }
  0x8d   : > { %p9_p4 = scmp.ge.s32.totalorder %s12_s9, 6  }
  0x8f   :  { %11 = sbr.rel (!%p9_p4) target bundleno = 1 (0x1), region = 58 }

// kernel: self_attn_forward.2
= control target key start
LH: loop header
LB: loop body
LE: loop exit
PB: predicated region body
PF: predicated region fallthrough
CT: control target
= control target key end

     0   :  { %s924_s15 = smov 0   ;;  %s926_s16 = smov 0   ;;  %s1073_s0 = inlined_call_operand.vmem [shape: f32[3,64,32], index: 0, kind: input, shape index: {}]   ;;  %s1074_s1 = inlined_call_operand.vmem [shape: f32[32,4], index: 1, kind: input, shape index: {}]   ;;  %s1075_s2 = inlined_call_operand.vmem [shape: f32[32,4], index: 2, kind: input, shape index: {}]   ;;  %s1076_s3 = inlined_call_operand.vmem [shape: f32[2,4], index: 3, kind: input, shape index: {}]   ;;  %s1077_s4 = inlined_call_operand.vmem [shape: f32[2,3,2], index: 4, kind: output, shape index: {}]  }
   0x1   :  { %s928_s17 = smov 0   ;;  %s930_s18 = smov 0  }
   0x2   :  { %s932_s19 = smov 0   ;;  %s934_s20 = smov 0  }
   0x3   :  { %s936_s21 = smov 0  }
   0x4 LB: > { %s23_s22 = sadd.s32 1, %s888_s19  ;;  %s26_s23 = sadd.s32 1, %s892_s20  ;;  %s896_s21 = sphi %s936_s21, %s14_s21   ;;  %s892_s20 = sphi %s934_s20, %s1083_s20   ;;  %s888_s19 = sphi %s932_s19, %s1082_s19   ;;  %s884_s18 = sphi %s930_s18, %s1081_s18   ;;  %s880_s17 = sphi %s928_s17, %s1080_s17   ;;  %s876_s16 = sphi %s926_s16, %s1079_s16   ;;  %s872_s15 = sphi %s924_s15, %s1078_s15  }
   0x5   : > { %p24_p0 = scmp.ge.s32.totalorder %s23_s22, 2  ;;  %p44_p1 = scmp.ne.s32.totalorder %s876_s16, %s872_s15 }
   0x6   : > { %p45_p2 = scmp.eq.s32.totalorder %s896_s21, 0  ;;  %s686_s24 = sshll.u32 %s892_s20, 1 }
   0x7   : > { %s1085_s22 = smov (%p24_p0, %s23_s22), 0  ;;  %s1087_s23 = smov (!%p24_p0, %s26_s23), %s892_s20 }
   0x8   : > { %p28_p3 = scmp.ge.s32.totalorder %s1087_s23, 2  ;;  %p46_p4 = por %p45_p2, %p44_p1 }
   0x9   : > { %s31_s25 = sadd.s32 %s888_s19, %s686_s24  ;;  %s37_s29 = sadd.s32 1, %s876_s16 }
   0xa   : > { %s1089_s23 = smov (%p28_p3, %s1087_s23), 0  ;;  %p689_p6 = scmp.ge.s32.totalorder %s896_s21, 4 }
   0xb   : > { %s687_s26 = sshll.u32 %s1089_s23, 1 }
   0xc   : > { %s33_s27 = sadd.s32 %s687_s26, %s1085_s22  ;;  %168 = sbr.rel (%p689_p6) target bundleno = 26 (0x1a), region = 28 }
   0xd   : > { %s34_s28 = ssub.s32 %s31_s25, %s33_s27 }
   0xe   : > { %p35_p5 = scmp.eq.s32.totalorder %s34_s28, 0 }
  0x10   : > { %s975_s30 = scalar_select %p35_p5, %s876_s16, %s37_s29  }
  0x13   : > { %171 = sbr.rel (!%p46_p4) target bundleno = 26 (0x1a), region = 32  ;;  %s173_s5 = sand.u32 (%p46_p4), 1, %s876_s16  }
  0x14   : > { %s712_s6 = sshll.u32 (%p46_p4), %s31_s25, 4  ;;  %s783_s7 = smul.u32 (%p46_p4), 48, %s173_s5 }
  0x15   : > { %s180_s10 = scalar_lea.vmem (%p46_p4), %s1073_s0, %s712_s6 }
  0x16   : > { %v218_v0 = vld [vmem:[%s180_s10] sm:$0xff] (%p46_p4)  ;;  %v220_v1 = vld [vmem:[%s180_s10 + $0x8] sm:$0xff] (%p46_p4)  ;;  %s175_s11 = scalar_lea.vmem (%p46_p4), [#allocation2], %s783_s7 }
  0x17   : > { %v222_v2 = vld [vmem:[%s180_s10 + $0x40] sm:$0xff] (%p46_p4)  ;;  %v224_v3 = vld [vmem:[%s180_s10 + $0x48] sm:$0xff] (%p46_p4)  ;;  %219 = vst [vmem:[%s175_s11] sm:$0xff] (%p46_p4), %v218_v0  ;;  %221 = vst [vmem:[%s175_s11 + $0x8] sm:$0xff] (%p46_p4), %v220_v1 }
  0x18   : > { %v226_v4 = vld [vmem:[%s180_s10 + $0x80] sm:$0xff] (%p46_p4)  ;;  %v228_v5 = vld [vmem:[%s180_s10 + $0x88] sm:$0xff] (%p46_p4)  ;;  %223 = vst [vmem:[%s175_s11 + $0x10] sm:$0xff] (%p46_p4), %v222_v2  ;;  %225 = vst [vmem:[%s175_s11 + $0x18] sm:$0xff] (%p46_p4), %v224_v3 }
  0x19   : > { %227 = vst [vmem:[%s175_s11 + $0x20] sm:$0xff] (%p46_p4), %v226_v4  ;;  %229 = vst [vmem:[%s175_s11 + $0x28] sm:$0xff] (%p46_p4), %v228_v5 }
  0x1a PF: > { %p693_p7 = scmp.ge.s32.totalorder %s896_s21, 1  ;;  %p234_p8 = scmp.lt.s32.totalorder %s896_s21, 5 }
  0x1c   : > { %p235_p9 = pnand %p693_p7, %p234_p8 }
  0x1d   : > { %s241_s12 = sand.u32 (!%p235_p9), 1, %s872_s15   ;;  %p268_p10 = scmp.lt.s32.totalorder (!%p235_p9), %s884_s18, 1 }
  0x1e   : > { %238 = sbr.rel (%p235_p9) target bundleno = 580 (0x244), region = 70  ;;  %p695_p11 = scmp.ne.s32.totalorder (!%p235_p9), %s880_s17, 0 }
  0x1f   : > { %s784_s13 = smul.u32 (!%p235_p9), 48, %s241_s12 }
  0x21   : > { %s992_s27 = scalar_lea.vmem (!%p235_p9), [#allocation2], %s784_s13 }
  0x25   : > { %s1091_s18 = smov (!%p268_p10, %s884_s18), 1  ;;  %275 = sbr.rel (%p695_p11) target bundleno = 44 (0x2c), region = 78 }
  0x26   : > { %s694_s14 = sshll.u32 %s1091_s18, 2  ;;  %vm276_vm0 = vcmask (!%p695_p11), 10240   ;;  %v898_v6 = vmov (!%p695_p11), 0.0  }
  0x27   : > { %s990_s26 = scalar_lea.vmem %s1077_s4, %s694_s14 }
  0x28   : > { %277 = vst.msk [vmem:[%s990_s26] sm:$0x7] (!%p695_p11), %vm276_vm0, %v898_v6 }
  0x2c PF: > { %v284_v7 = vld [vmem:[%s1074_s1] sm:$0xff]  ;;  %v285_v8 = vld [vmem:[%s1074_s1 + $0x8] sm:$0xff]  ;;  %vm288_vm1 = vcmask 261120   ;;  %v286_v12 = vld [vmem:[%s1074_s1 + $0x10] sm:$0xff]  ;;  %vm541_vm2 = vcmask 31744   ;;  %vm577_vm3 = vcmask 130112  }
  0x2d   : > { %v402_v9 = vld [vmem:[%s1075_s2] sm:$0xff]  ;;  %v767_v10 = vpack.c.bf16 %v285_v8, %v284_v7  ;;  %v403_v11 = vld [vmem:[%s1075_s2 + $0x8] sm:$0xff]  ;;  %v287_v13 = vld [vmem:[%s1074_s1 + $0x18] sm:$0xff]  ;;  %vm597_vm4 = vcmask 1041409   ;;  %vm599_vm5 = vcmask 1042434   ;;  %vm602_vm6 = vcmask 124928  }
  0x2e   : > { %v775_v14 = vpack.c.bf16 %v403_v11, %v402_v9  ;;  %v771_v15 = vpack.c.bf16 %v287_v13, %v286_v12  ;;  %v404_v16 = vld [vmem:[%s1075_s2 + $0x10] sm:$0xff]  ;;  %v405_v17 = vld [vmem:[%s1075_s2 + $0x18] sm:$0xff]  ;;  %v708_v25 = vld [vmem:[%s1076_s3 + $0x1] ss:$0 sm:$0xff]  ;;  %v566_v11 = vlaneseq  ;;  %vm607_vm7 = vcmask 7168  }
  0x2f   : > { %v278_v18 = vld [vmem:[%s992_s27] sm:$0xff]  ;;  %768 = vmatprep.subr.bf16.mxu0 %v767_v10  ;;  %v779_v19 = vpack.c.bf16 %v405_v17, %v404_v16  ;;  %v279_v20 = vld [vmem:[%s992_s27 + $0x8] sm:$0xff]  ;;  %v280_v21 = vld [vmem:[%s992_s27 + $0x10] sm:$0xff]  ;;  %vm610_vm8 = vcmask 10240  }
  0x30   : > { %741 = vmatprep.mubr.msk.f32.mxu0 %vm288_vm1, %v278_v18  ;;  %776 = vmatprep.subr.bf16.mxu1 %v775_v14  ;;  %v281_v22 = vld [vmem:[%s992_s27 + $0x18] sm:$0xff]  ;;  %v282_v23 = vld [vmem:[%s992_s27 + $0x20] sm:$0xff]  ;;  %v283_v24 = vld [vmem:[%s992_s27 + $0x28] sm:$0xff]  ;;  %v567_v12 = vand.u32 127, %v566_v11 }
  0x31   : > { %770 = vmatpush3.bf16.msra.mxu0 %v767_v10  ;;  %778 = vmatpush3.bf16.msra.mxu1 %v775_v14  ;;  %v709_v29 = vld [vmem:[%s1076_s3] ss:$0 sm:$0xff]  ;;  %v569_v14 = vshrl.u32 %v566_v11, 7 }
  0x32   : > { %772 = vmatprep.subr.bf16.mxu0 %v771_v15  ;;  %780 = vmatprep.subr.bf16.mxu1 %v779_v19 }
  0x33   : > { %758 = vmatprep.mubr.msk.f32.mxu1 %vm288_vm1, %v278_v18  ;;  %v570_v18 = vsub.s32 %v567_v12, %v569_v14 }
  0x35   : > { %774 = vmatpush3.bf16.msra.mxu0 %v771_v15  ;;  %782 = vmatpush3.bf16.msra.mxu1 %v779_v19  ;;  %v572_v15 = vadd.s32 4294967288, %v567_v12 }
  0x37   : > { %v575_v19 = vsub.s32 %v572_v15, %v569_v14 }
  0x38   : > { %742 = vmatmul.mubr.msk.f32.vlgmr.msra.gmra.mrb[0].mxu0 %vm288_vm1, %v279_v20  ;;  %759 = vmatmul.mubr.msk.f32.vlgmr.msra.gmra.mrb[0].mxu1 %vm288_vm1, %v279_v20 }
  0x39   : > { %744 = vmatprep.mubr.msk.f32.mxu0 %vm288_vm1, %v280_v21  ;;  %761 = vmatprep.mubr.msk.f32.mxu1 %vm288_vm1, %v280_v21 }
  0x3c   : > { %745 = vmatmul.mubr.msk.f32.gmra.mrb[2].mxu0 %vm288_vm1, %v281_v22  ;;  %762 = vmatmul.mubr.msk.f32.gmra.mrb[2].mxu1 %vm288_vm1, %v281_v22 }
  0x3d   : > { %747 = vmatprep.mubr.msk.f32.mxu0 %vm288_vm1, %v282_v23  ;;  %764 = vmatprep.mubr.msk.f32.mxu1 %vm288_vm1, %v282_v23 }
  0x40   : > { %748 = vmatmul.mubr.msk.f32.gmra.mrb[4].mxu0 %vm288_vm1, %v283_v24  ;;  %765 = vmatmul.mubr.msk.f32.gmra.mrb[4].mxu1 %vm288_vm1, %v283_v24 }
 0x10b   : > { %v743_v26 = vpop.f32.mrb[0].mxu0  ;;  %v760_v28 = vpop.f32.mrb[0].mxu1 }
 0x10c   : > { %v514_v27 = vmul.f32 %v743_v26, %v708_v25  ;;  %v373_v30 = vpop.f32.mrb[1].mxu0  ;;  %v504_v31 = vmul.f32 %v760_v28, %v743_v26  ;;  %v472_v33 = vpop.f32.mrb[1].mxu1  ;;  %v530_v35 = vmul.f32 %v760_v28, %v709_v29 }
 0x10d   : > { %v513_v32 = vmul.f32 %v708_v25, %v373_v30  ;;  %v503_v34 = vmul.f32 %v472_v33, %v373_v30  ;;  %v529_v39 = vmul.f32 %v709_v29, %v472_v33 }
 0x10e   : > { %v520_v37 = vadd.f32 %v514_v27, %v504_v31 }
 0x10f   : > { %v746_v36 = vpop.f32.mrb[2].mxu0  ;;  %v519_v38 = vadd.f32 %v513_v32, %v503_v34  ;;  %v763_v41 = vpop.f32.mrb[2].mxu1 }
 0x110   : > { %v516_v40 = vmul.f32 %v746_v36, %v708_v25  ;;  %v383_v42 = vpop.f32.mrb[3].mxu0  ;;  %v506_v43 = vmul.f32 %v763_v41, %v746_v36  ;;  %v482_v45 = vpop.f32.mrb[3].mxu1  ;;  %v536_v46 = vadd.f32 %v530_v35, %v520_v37  ;;  %v532_v49 = vmul.f32 %v763_v41, %v709_v29  ;;  %v606_v35 = vld [vmem:[%s990_s26] sm:$0x7] }
 0x111   : > { %v515_v44 = vmul.f32 %v708_v25, %v383_v42  ;;  %v505_v47 = vmul.f32 %v482_v45, %v383_v42  ;;  %v535_v48 = vadd.f32 %v529_v39, %v519_v38  ;;  %v531_v54 = vmul.f32 %v709_v29, %v482_v45 }
 0x112   : > { %v545_v50 = vsel %vm541_vm2, %v536_v46, 0.0  ;;  %v522_v52 = vadd.f32 %v516_v40, %v506_v43 }
 0x113   : > { %v749_v51 = vpop.f32.mrb[4].mxu0  ;;  %v521_v53 = vadd.f32 %v515_v44, %v505_v47  ;;  %v766_v55 = vpop.f32.mrb[4].mxu1  ;;  %546 = vadd.xlane.f32.xlu0 %v545_v50  ;;  %v542_v3 = vsel %vm541_vm2, %v535_v48, 0.0 }
 0x114   : > { %v518_v56 = vmul.f32 %v749_v51, %v708_v25  ;;  %v393_v57 = vpop.f32.mrb[5].mxu0  ;;  %v534_v58 = vmul.f32 %v766_v55, %v709_v29  ;;  %v508_v59 = vmul.f32 %v766_v55, %v749_v51  ;;  %v492_v61 = vpop.f32.mrb[5].mxu1  ;;  %v538_v62 = vadd.f32 %v532_v49, %v522_v52 }
 0x115   : > { %v517_v60 = vmul.f32 %v708_v25, %v393_v57  ;;  %v507_v63 = vmul.f32 %v492_v61, %v393_v57  ;;  %v533_v0 = vmul.f32 %v709_v29, %v492_v61  ;;  %v537_v1 = vadd.f32 %v531_v54, %v521_v53 }
 0x116   : > { %v524_v2 = vadd.f32 %v518_v56, %v508_v59  ;;  %v551_v4 = vsel %vm541_vm2, %v538_v62, 0.0 }
 0x117   : > { %v523_v5 = vadd.f32 %v517_v60, %v507_v63  ;;  %543 = vadd.xlane.f32.xlu0 %v542_v3  ;;  %552 = vadd.xlane.f32.xlu1 %v551_v4  ;;  %v548_v8 = vsel %vm541_vm2, %v537_v1, 0.0 }
 0x118   : > { %v540_v6 = vadd.f32 %v534_v58, %v524_v2 }
 0x119   : > { %v539_v7 = vadd.f32 %v533_v0, %v523_v5 }
 0x11a   : > { %v557_v10 = vsel %vm541_vm2, %v540_v6, 0.0 }
 0x11b   : > { %549 = vadd.xlane.f32.xlu1 %v548_v8  ;;  %v554_v9 = vsel %vm541_vm2, %v539_v7, 0.0 }
 0x11c   : > { %555 = vadd.xlane.f32.xlu0 %v554_v9 }
 0x11f   : > { %558 = vadd.xlane.f32.xlu1 %v557_v10 }
 0x1a0   : > { %v547_v13 = vpop.xlane.xlu0 %546 }
 0x1a1   : > { %v576_v25 = vrot.slane %v547_v13, %v575_v19 }
 0x1a4   : > { %v544_v16 = vpop.xlane.xlu0 %543  ;;  %v553_v17 = vpop.xlane.xlu1 %552 }
 0x1a5   : > { %v571_v22 = vrot.slane %v544_v16, %v570_v18  ;;  %v586_v23 = vrot.slane %v553_v17, %v575_v19 }
 0x1a7   : > { %v578_v30 = vsel %vm577_vm3, %v576_v25, %v571_v22 }
 0x1a8   : > { %v550_v20 = vpop.xlane.xlu1 %549 }
 0x1a9   : > { %v582_v21 = vrot.slane %v550_v20, %v570_v18  ;;  %v556_v24 = vpop.xlane.xlu0 %555 }
 0x1aa   : > { %v591_v28 = vrot.slane %v556_v24, %v570_v18 }
 0x1ab   : > { %v587_v26 = vsel %vm577_vm3, %v586_v23, %v582_v21 }
 0x1ac   : > { %v559_v27 = vpop.xlane.xlu1 %558  ;;  %v598_v32 = vsel %vm597_vm4, %v587_v26, %v578_v30 }
 0x1ad   : > { %v595_v29 = vrot.slane %v559_v27, %v575_v19 }
 0x1af   : > { %v596_v31 = vsel %vm577_vm3, %v595_v29, %v591_v28 }
 0x1b0   : > { %v600_v33 = vsel %vm599_vm5, %v596_v31, %v598_v32 }
 0x1b1   : > { %v603_v34 = vsel %vm602_vm6, %v600_v33, 0.0 }
 0x1b2   : > { %604 = vadd.xlane.f32.xlu0 %v603_v34 }
 0x23f   : > { %v605_v36 = vpop.xlane.xlu0 %604 }
 0x240   : > { %v608_v37 = vsel %vm607_vm7, %v605_v36, 0.0 }
 0x241   : > { %v609_v38 = vadd.f32 %v608_v37, %v606_v35 }
 0x243   : > { %611 = vst.msk [vmem:[%s990_s26] sm:$0x7] %vm610_vm8, %v609_v38 }
 0x244 PF: > { %s14_s21 = sadd.s32 1, %s896_s21   ;;  %s1078_s15 = smov %s876_s16 }
 0x245   : > { %p11_p12 = scmp.ge.s32.totalorder %s14_s21, 6   ;;  %s1079_s16 = smov %s975_s30 }
 0x246   : > { %s1080_s17 = smov %s888_s19  ;;  %s1081_s18 = smov %s892_s20 }
 0x247   : > { %s1082_s19 = smov %s1085_s22  ;;  %s1083_s20 = smov %s1089_s23 }
 0x248   :  { %13 = sbr.rel (!%p11_p12) target bundleno = 4 (0x4), region = 113 }

</bundles_post_ra>
